<compile_context>
chip_gen: v5e
topology: v5e:2x2
jax: 0.10.0
libtpu: 0.0.40
codegen_flags: <defaults>
</compile_context>

<pallas_src>
import functools
import math

import numpy as np
import jax
import jax.numpy as jnp
from jax import lax
from jax.experimental import pallas as pl
from jax.experimental.pallas import tpu as pltpu


LN_EPS = 1e-5
_MAX_TILE_M = 256
_VMEM_LIMIT = 32 * 1024 * 1024      # kept <= 32 MiB: safe on v7x (64 MiB physical per TC)


def _round_up(v, m):
    return ((v + m - 1) // m) * m


@functools.lru_cache(maxsize=1)
def _row_splits():
    # Split row tiles only on multi-TensorCore chips (v7x): >=2 grid steps let
    # dimension_semantics=("parallel",) shard work across both TCs.  On single-TC v5e/v6e an
    # extra grid step is pure per-step overhead, so keep a single big tile there.
    try:
        kind = jax.devices()[0].device_kind.lower()
    except Exception:
        return 1
    return 2 if ("v7" in kind or "7x" in kind) else 1


def _cparams():
    return pltpu.CompilerParams(dimension_semantics=("parallel",),
                                vmem_limit_bytes=_VMEM_LIMIT)


def _bf16(x):
    return x.astype(jnp.bfloat16)


def _gelu(y):
    # TODO(synk): torch nn.GELU default is exact erf GELU; tanh approximation used for
    # Mosaic-safe lowering (max abs error ~1e-3).
    c = math.sqrt(2.0 / math.pi)
    return 0.5 * y * (1.0 + jnp.tanh(c * (y + 0.044715 * y * y * y)))


def _ln(x, g, b, eps):
    mu = jnp.mean(x, axis=-1, keepdims=True)
    xc = x - mu
    var = jnp.mean(xc * xc, axis=-1, keepdims=True)
    return xc * lax.rsqrt(var + eps) * g + b


# ----------------------------- Pallas kernels -----------------------------

def _linear_kernel(x_ref, w_ref, b_ref, o_ref, *, act):
    y = jnp.dot(_bf16(x_ref[...]), w_ref[...],
                preferred_element_type=jnp.float32) + b_ref[...]
    if act == "gelu":
        y = _gelu(y)
    o_ref[...] = y


def _ln_linear_kernel(x_ref, g_ref, be_ref, w_ref, b_ref, o_ref, *, act, eps):
    xn = _ln(x_ref[...], g_ref[...], be_ref[...], eps)
    y = jnp.dot(_bf16(xn), w_ref[...],
                preferred_element_type=jnp.float32) + b_ref[...]
    if act == "gelu":
        y = _gelu(y)
    o_ref[...] = y


def _ln_mlp_res_kernel(x_ref, g_ref, be_ref, w1_ref, b1_ref, w2_ref, b2_ref, o_ref,
                       *, eps, alpha):
    x = x_ref[...]
    xn = _ln(x, g_ref[...], be_ref[...], eps)
    h = _gelu(jnp.dot(_bf16(xn), w1_ref[...],
                      preferred_element_type=jnp.float32) + b1_ref[...])
    y = jnp.dot(_bf16(h), w2_ref[...],
                preferred_element_type=jnp.float32) + b2_ref[...]
    o_ref[...] = x + alpha * y


def _layernorm_kernel(x_ref, g_ref, b_ref, o_ref, *, eps):
    o_ref[...] = _ln(x_ref[...], g_ref[...], b_ref[...], eps)


def _attn_block_kernel(*refs, scale, num_heads, alpha, has_bias):
    # Per batch element:  q (N, dout), kv (Ns, 2*dout), [bias (1, Ns)], wproj (dout, dout) bf16,
    # bproj (1, dout), resid (N, dout)  ->  o (N, dout) = resid + alpha * proj(attn(q, k, v)).
    if has_bias:
        q_ref, kv_ref, b_ref, wp_ref, bp_ref, r_ref, o_ref = refs
        bias = b_ref[...]
    else:
        q_ref, kv_ref, wp_ref, bp_ref, r_ref, o_ref = refs
        bias = None
    dout = q_ref.shape[-1]
    d = dout // num_heads
    q = q_ref[...]
    kv = kv_ref[...]
    k = kv[:, :dout]
    v = kv[:, dout:]
    outs = []
    for hh in range(num_heads):
        qh = _bf16(q[:, hh * d:(hh + 1) * d])
        kh = _bf16(k[:, hh * d:(hh + 1) * d])
        vh = _bf16(v[:, hh * d:(hh + 1) * d])
        s = jnp.dot(qh, kh.T, preferred_element_type=jnp.float32) * scale
        if bias is not None:
            s = s + bias
        s = s - jnp.max(s, axis=-1, keepdims=True)
        p = jnp.exp(s)
        p = p / jnp.sum(p, axis=-1, keepdims=True)
        outs.append(jnp.dot(_bf16(p), vh, preferred_element_type=jnp.float32))
    o = outs[0] if num_heads == 1 else jnp.concatenate(outs, axis=-1)
    y = jnp.dot(_bf16(o), wp_ref[...],
                preferred_element_type=jnp.float32) + bp_ref[...]
    o_ref[...] = r_ref[...] + alpha * y


# ----------------------------- Pallas wrappers -----------------------------

def _tile_rows(x2):
    M = x2.shape[0]
    splits = _row_splits()
    if splits > 1 and M >= 16:
        tile_m = min(_MAX_TILE_M, _round_up(-(-M // splits), 8))
    else:
        tile_m = min(_MAX_TILE_M, _round_up(M, 8))
    Mp = _round_up(M, tile_m)
    if Mp != M:
        x2 = jnp.pad(x2, ((0, Mp - M), (0, 0)))
    return x2, M, Mp, tile_m


def pallas_linear(x, w, b, act=None, ln=None):
    """y = (LN(x) if ln else x) @ w + b (optionally GELU) fused in one kernel.
    MXU operands are bf16, accumulation is f32; output written at natural width."""
    orig = x.shape
    K = orig[-1]
    N = w.shape[-1]
    x2, M, Mp, tile_m = _tile_rows(x.reshape(-1, K).astype(jnp.float32))
    wb = _bf16(w)
    bb = b.reshape(1, N).astype(jnp.float32)
    x_spec = pl.BlockSpec((tile_m, K), lambda i: (i, 0))
    vec_spec = pl.BlockSpec((1, K), lambda i: (0, 0))
    w_spec = pl.BlockSpec((K, N), lambda i: (0, 0))
    b_spec = pl.BlockSpec((1, N), lambda i: (0, 0))
    if ln is None:
        kern = functools.partial(_linear_kernel, act=act)
        in_specs = [x_spec, w_spec, b_spec]
        args = (x2, wb, bb)
    else:
        g, be = ln
        kern = functools.partial(_ln_linear_kernel, act=act, eps=LN_EPS)
        in_specs = [x_spec, vec_spec, vec_spec, w_spec, b_spec]
        args = (x2, g.reshape(1, K).astype(jnp.float32),
                be.reshape(1, K).astype(jnp.float32), wb, bb)
    out = pl.pallas_call(
        kern,
        out_shape=jax.ShapeDtypeStruct((Mp, N), jnp.float32),
        grid=(Mp // tile_m,),
        in_specs=in_specs,
        out_specs=pl.BlockSpec((tile_m, N), lambda i: (i, 0)),
        compiler_params=_cparams(),
    )(*args)
    if Mp != M:
        out = out[:M]
    return out.reshape(orig[:-1] + (N,))


def pallas_mlp_block(x, norm2, mlp, alpha):
    """out = x + alpha * fc2(GELU(fc1(LN(x)))) fused in one kernel (hidden stays in VMEM)."""
    orig = x.shape
    C = orig[-1]
    H1 = mlp['fc1']['w'].shape[-1]
    x2, M, Mp, tile_m = _tile_rows(x.reshape(-1, C).astype(jnp.float32))
    out = pl.pallas_call(
        functools.partial(_ln_mlp_res_kernel, eps=LN_EPS, alpha=float(alpha)),
        out_shape=jax.ShapeDtypeStruct((Mp, C), jnp.float32),
        grid=(Mp // tile_m,),
        in_specs=[
            pl.BlockSpec((tile_m, C), lambda i: (i, 0)),
            pl.BlockSpec((1, C), lambda i: (0, 0)),
            pl.BlockSpec((1, C), lambda i: (0, 0)),
            pl.BlockSpec((C, H1), lambda i: (0, 0)),
            pl.BlockSpec((1, H1), lambda i: (0, 0)),
            pl.BlockSpec((H1, C), lambda i: (0, 0)),
            pl.BlockSpec((1, C), lambda i: (0, 0)),
        ],
        out_specs=pl.BlockSpec((tile_m, C), lambda i: (i, 0)),
        compiler_params=_cparams(),
    )(x2,
      norm2['w'].reshape(1, C).astype(jnp.float32),
      norm2['b'].reshape(1, C).astype(jnp.float32),
      _bf16(mlp['fc1']['w']), mlp['fc1']['b'].reshape(1, H1).astype(jnp.float32),
      _bf16(mlp['fc2']['w']), mlp['fc2']['b'].reshape(1, C).astype(jnp.float32))
    if Mp != M:
        out = out[:M]
    return out.reshape(orig)


def pallas_layernorm(x, g, b, eps=LN_EPS):
    orig = x.shape
    C = orig[-1]
    x2, M, Mp, tile_m = _tile_rows(x.reshape(-1, C).astype(jnp.float32))
    out = pl.pallas_call(
        functools.partial(_layernorm_kernel, eps=eps),
        out_shape=jax.ShapeDtypeStruct((Mp, C), jnp.float32),
        grid=(Mp // tile_m,),
        in_specs=[
            pl.BlockSpec((tile_m, C), lambda i: (i, 0)),
            pl.BlockSpec((1, C), lambda i: (0, 0)),
            pl.BlockSpec((1, C), lambda i: (0, 0)),
        ],
        out_specs=pl.BlockSpec((tile_m, C), lambda i: (i, 0)),
        compiler_params=_cparams(),
    )(x2, g.reshape(1, C).astype(jnp.float32), b.reshape(1, C).astype(jnp.float32))
    if Mp != M:
        out = out[:M]
    return out.reshape(orig)


def attention_block(attn_p, q_flat, kv_flat, resid, alpha, conf=None):
    """Fused multi-head attention + output projection + residual:
    out = resid + alpha * proj(softmax(q k^T * scale [+ bias]) v).
    q_flat: (B, N, dout); kv_flat: (B, Ns, 2*dout); resid: (B, N, dout); conf: (B, Ns, 1)."""
    B, N, dout = q_flat.shape
    Ns = kv_flat.shape[1]
    h = attn_p['num_heads']
    wproj = _bf16(attn_p['proj']['w'])
    bproj = attn_p['proj']['b'].reshape(1, dout).astype(jnp.float32)
    in_specs = [
        pl.BlockSpec((None, N, dout), lambda i: (i, 0, 0)),
        pl.BlockSpec((None, Ns, 2 * dout), lambda i: (i, 0, 0)),
    ]
    args = [q_flat.astype(jnp.float32), kv_flat.astype(jnp.float32)]
    if conf is not None:
        in_specs.append(pl.BlockSpec((None, 1, Ns), lambda i: (i, 0, 0)))
        args.append(conf.reshape(B, 1, Ns).astype(jnp.float32))
    in_specs += [
        pl.BlockSpec((dout, dout), lambda i: (0, 0)),
        pl.BlockSpec((1, dout), lambda i: (0, 0)),
        pl.BlockSpec((None, N, dout), lambda i: (i, 0, 0)),
    ]
    args += [wproj, bproj, resid.astype(jnp.float32)]
    kern = functools.partial(_attn_block_kernel, scale=float(attn_p['scale']),
                             num_heads=h, alpha=float(alpha), has_bias=conf is not None)
    return pl.pallas_call(
        kern,
        out_shape=jax.ShapeDtypeStruct((B, N, dout), jnp.float32),
        grid=(B,),
        in_specs=in_specs,
        out_specs=pl.BlockSpec((None, N, dout), lambda i: (i, 0, 0)),
        compiler_params=_cparams(),
    )(*args)


# ----------------------------- convolutions (Pallas matmuls) -----------------------------

def conv_nonoverlap_tokens(tokens, H, W, w, b):
    """k x k conv with stride k, no padding, on row-major (B, H*W, C) tokens.
    im2col here is a pure reshape/transpose (no data duplication)."""
    B, _, C = tokens.shape
    Cout, Cin, kk, _ = w.shape
    Ho, Wo = H // kk, W // kk
    t = tokens.reshape(B, H, W, C)[:, :Ho * kk, :Wo * kk]
    p = t.reshape(B, Ho, kk, Wo, kk, C).transpose(0, 1, 3, 5, 2, 4)
    p = p.reshape(B * Ho * Wo, C * kk * kk)
    wmat = w.reshape(Cout, Cin * kk * kk).T
    out = pallas_linear(p, wmat, b)
    return out.reshape(B, Ho * Wo, Cout), Ho, Wo


def conv_nonoverlap_nchw_tokens(x, w, b):
    B, C, H, W = x.shape
    tokens = x.transpose(0, 2, 3, 1).reshape(B, H * W, C)
    return conv_nonoverlap_tokens(tokens, H, W, w, b)


def conv2d_nchw(x, w, b, stride, padding):
    """General NCHW conv via NHWC channel-concat im2col + Pallas matmul (only the tiny
    3x3 down-layer conv uses it); avoids the stack + big-transpose relayouts."""
    B, Cin, H, W = x.shape
    Cout, _, kh, kw = w.shape
    Ho = (H + 2 * padding - kh) // stride + 1
    Wo = (W + 2 * padding - kw) // stride + 1
    xh = x.transpose(0, 2, 3, 1)                                   # NHWC
    xh = jnp.pad(xh, ((0, 0), (padding, padding), (padding, padding), (0, 0)))
    cols = [xh[:, i:i + stride * Ho:stride, j:j + stride * Wo:stride, :]
            for i in range(kh) for j in range(kw)]
    patches = jnp.concatenate(cols, axis=-1).reshape(B * Ho * Wo, kh * kw * Cin)
    wmat = w.transpose(2, 3, 1, 0).reshape(kh * kw * Cin, Cout)    # matches tap-major layout
    out = pallas_linear(patches, wmat, b)
    return out.reshape(B, Ho, Wo, Cout).transpose(0, 3, 1, 2)


# ----------------------------- JAX glue (gather / scatter / sampling) -----------------------------

def grid_sample_bilinear(img, gx, gy):
    """F.grid_sample equivalent (bilinear, zeros padding, align_corners=False).
    img: (B, C, H, W); gx, gy: (B, N) in [-1, 1]. Returns (B, C, N)."""
    B, C, H, W = img.shape
    ix = ((gx + 1.0) * W - 1.0) / 2.0
    iy = ((gy + 1.0) * H - 1.0) / 2.0
    x0 = jnp.floor(ix)
    y0 = jnp.floor(iy)
    flat = img.reshape(B, C, H * W)

    def gather(xi, yi):
        valid = ((xi >= 0) & (xi <= W - 1) & (yi >= 0) & (yi <= H - 1)).astype(img.dtype)
        xc = jnp.clip(xi, 0, W - 1).astype(jnp.int32)
        yc = jnp.clip(yi, 0, H - 1).astype(jnp.int32)
        idx = (yc * W + xc)[:, None, :]
        idx = jnp.broadcast_to(idx, (B, C, idx.shape[-1]))
        return jnp.take_along_axis(flat, idx, axis=2) * valid[:, None, :]

    wx1 = ix - x0
    wx0 = 1.0 - wx1
    wy1 = iy - y0
    wy0 = 1.0 - wy1
    return (gather(x0, y0) * (wx0 * wy0)[:, None, :]
            + gather(x0 + 1, y0) * (wx1 * wy0)[:, None, :]
            + gather(x0, y0 + 1) * (wx0 * wy1)[:, None, :]
            + gather(x0 + 1, y0 + 1) * (wx1 * wy1)[:, None, :])


def gaussian_filt(x, kernel_size=3, sigma=2.0):
    # Fixed small depthwise Gaussian blur; kept as a lax depthwise conv (not a hot path).
    C = x.shape[1]
    mean = (kernel_size - 1) / 2.0
    var = float(sigma) ** 2.0
    coords = np.arange(kernel_size, dtype=np.float32)
    xg, yg = np.meshgrid(coords, coords)
    kern = (1.0 / (2.0 * np.pi * var)) * np.exp(-((xg - mean) ** 2 + (yg - mean) ** 2) / (2.0 * var))
    kern = kern / kern.sum()
    w = jnp.asarray(np.tile(kern[None, None], (C, 1, 1, 1)), x.dtype)
    pad = (kernel_size - 1) // 2
    return lax.conv_general_dilated(
        x, w, window_strides=(1, 1), padding=((pad, pad), (pad, pad)),
        feature_group_count=C, dimension_numbers=('NCHW', 'OIHW', 'NCHW'))


def reconstruct_feature(feature, mask, kernel_size, sigma):
    if kernel_size <= 1:
        return feature
    feature = feature * mask
    out = gaussian_filt(jnp.concatenate([feature, mask], axis=1), kernel_size, sigma)
    feature_inter = out[:, :-1]
    mask_inter = out[:, -1:]
    feature_inter = feature_inter / (mask_inter + 1e-6)
    mask_bin = (mask_inter > 0).astype(feature.dtype)
    feature_inter = feature_inter * mask_bin
    return feature + (1.0 - mask) * feature_inter


def token2map(x, loc, map_size, kernel_size, sigma):
    H, W = map_size
    B, N, C = x.shape
    loc = jnp.clip(loc, 0.0, 1.0)
    loc = loc * jnp.asarray([W - 1, H - 1], dtype=loc.dtype)[None, None, :]
    loc = jnp.round(loc).astype(jnp.int32)
    idx = loc[..., 0] + loc[..., 1] * W
    idx = idx + jnp.arange(B, dtype=jnp.int32)[:, None] * (H * W)
    src = jnp.concatenate([x, jnp.ones((B, N, 1), x.dtype)], axis=-1).reshape(B * N, C + 1)
    out = jnp.zeros((B * H * W, C + 1), x.dtype).at[idx.reshape(-1)].add(src)
    out = out.reshape(B, H, W, C + 1).transpose(0, 3, 1, 2)
    feature, mask = out[:, :-1], out[:, -1:]
    feature = feature / (mask + 1e-6)
    mask = (mask > 0).astype(feature.dtype)
    feature = feature * mask
    return reconstruct_feature(feature, mask, kernel_size, sigma)


def map2token(feature_map, loc_xy):
    g = loc_xy.astype(feature_map.dtype) * 2.0 - 1.0
    out = grid_sample_bilinear(feature_map, g[..., 0], g[..., 1])
    return out.transpose(0, 2, 1)


def get_pos_embed(pos_embed, loc_xy, pos_size):
    H, W = pos_size
    B = loc_xy.shape[0]
    C = pos_embed.shape[-1]
    pe = pos_embed.reshape(1, H, W, C).transpose(0, 3, 1, 2)
    pe = jnp.broadcast_to(pe, (B, C, H, W))
    g = loc_xy * 2.0 - 1.0
    out = grid_sample_bilinear(pe, g[..., 0], g[..., 1])
    return out.transpose(0, 2, 1)


def gumble_top_k(x, k, key, p_value=1e-6):
    noise = jax.random.uniform(key, x.shape, x.dtype)
    noise = -jnp.log(noise + p_value)
    noise = -jnp.log(noise + p_value)
    x = x + noise
    _, idx = lax.top_k(x[..., 0], k)
    return idx                                                 # (B, k)


# ----------------------------- parameter init -----------------------------

class KeyGen:
    def __init__(self, seed=0):
        self._key = jax.random.PRNGKey(seed)

    def __call__(self):
        self._key, sub = jax.random.split(self._key)
        return sub


def trunc_normal(key, shape, std=0.02):
    return (std * jax.random.truncated_normal(key, -2.0, 2.0, shape)).astype(jnp.float32)


def init_linear(kg, din, dout):
    return {'w': trunc_normal(kg(), (din, dout)), 'b': jnp.zeros((dout,), jnp.float32)}


def init_ln(dim):
    return {'w': jnp.ones((dim,), jnp.float32), 'b': jnp.zeros((dim,), jnp.float32)}


def init_conv(kg, cout, cin, kh, kw):
    return {'w': trunc_normal(kg(), (cout, cin, kh, kw)), 'b': jnp.zeros((cout,), jnp.float32)}


def init_attention(kg, dim, dim_out, num_heads, sr_ratio):
    q = init_linear(kg, dim, dim_out)
    k = init_linear(kg, dim, dim_out)
    v = init_linear(kg, dim, dim_out)
    p = {
        'q': q, 'k': k, 'v': v,
        'proj': init_linear(kg, dim_out, dim_out),
        # pre-concatenated QKV / KV weights (constant-folded; no per-step concat in the graph)
        'wqkv': jnp.concatenate([q['w'], k['w'], v['w']], axis=1),
        'bqkv': jnp.concatenate([q['b'], k['b'], v['b']], axis=0),
        'wkv': jnp.concatenate([k['w'], v['w']], axis=1),
        'bkv': jnp.concatenate([k['b'], v['b']], axis=0),
        'num_heads': num_heads,
        'dim_out': dim_out,
        'sr_ratio': sr_ratio,
        'scale': float((dim // num_heads) ** -0.5),
    }
    if sr_ratio > 1:
        p['sr'] = init_conv(kg, dim, dim, sr_ratio, sr_ratio)
        p['norm'] = init_ln(dim)
    return p


def init_block(kg, dim, num_heads, mlp_ratio, sr_ratio, dim_out=None, alpha=1.0):
    if dim_out is None:
        dim_out = dim
    hidden = int(dim_out * mlp_ratio)
    return {
        'norm1': init_ln(dim),
        'attn': init_attention(kg, dim, dim_out, num_heads, sr_ratio),
        'norm2': init_ln(dim_out),
        'mlp': {'fc1': init_linear(kg, dim_out, hidden), 'fc2': init_linear(kg, hidden, dim_out)},
        'fc': init_linear(kg, dim, dim_out) if dim_out != dim else None,
        'alpha': alpha,
    }


def init_down_layer(kg, sample_num, embed_dim, block):
    return {
        'sample_num': sample_num,
        'norm': init_ln(embed_dim),
        'conf': init_linear(kg, embed_dim, 1),
        'conv': init_conv(kg, embed_dim, embed_dim, 3, 3),
        'block': block,
    }


def init_mypvt9(kg, cfg):
    dims, heads = cfg['embed_dims'], cfg['num_heads']
    mr, sr, depths, alpha = cfg['mlp_ratios'], cfg['sr_ratios'], cfg['depths'], cfg['alpha']
    num_patches = (cfg['img_size'] // cfg['patch_size']) ** 2
    sample_num = num_patches
    p = {}
    p['patch_embed'] = {
        'proj': init_conv(kg, dims[0], cfg['in_chans'], cfg['patch_size'], cfg['patch_size']),
        'norm': init_ln(dims[0]),
    }
    p['pos_embed1'] = trunc_normal(kg(), (1, num_patches, dims[0]))
    p['pos_embed2'] = trunc_normal(kg(), (1, num_patches, dims[1]))
    p['pos_embed3'] = trunc_normal(kg(), (1, num_patches, dims[2]))
    p['pos_embed4'] = trunc_normal(kg(), (1, num_patches, dims[3]))
    p['block1'] = [init_block(kg, dims[0], heads[0], mr[0], sr[0]) for _ in range(depths[0])]
    sample_num //= 4
    p['down1'] = init_down_layer(kg, sample_num, dims[0],
                                 init_block(kg, dims[0], heads[1], mr[1], 1, dim_out=dims[1], alpha=alpha))
    p['block2'] = [init_block(kg, dims[1], heads[1], mr[1], sr[1], alpha=alpha) for _ in range(1, depths[1])]
    sample_num //= 4
    p['down2'] = init_down_layer(kg, sample_num, dims[1],
                                 init_block(kg, dims[1], heads[2], mr[2], 1, dim_out=dims[2], alpha=alpha))
    p['block3'] = [init_block(kg, dims[2], heads[2], mr[2], sr[2], alpha=alpha) for _ in range(1, depths[2])]
    sample_num //= 4
    p['down3'] = init_down_layer(kg, sample_num, dims[2],
                                 init_block(kg, dims[2], heads[3], mr[3], 1, dim_out=dims[3], alpha=alpha))
    p['block4'] = [init_block(kg, dims[3], heads[3], mr[3], sr[3], alpha=alpha) for _ in range(1, depths[3])]
    p['norm'] = init_ln(dims[3])
    p['cls_token'] = trunc_normal(kg(), (1, 1, dims[3]))
    p['head'] = init_linear(kg, dims[3], cfg['num_classes'])
    return p


# ----------------------------- forward passes -----------------------------

def pvt_block_forward(p, x, H, W):
    attn = p['attn']
    n1w, n1b = p['norm1']['w'], p['norm1']['b']
    if attn['sr_ratio'] > 1:
        # Q: LN fused into the projection (reads x directly, no dependency on the standalone LN)
        q_flat = pallas_linear(x, attn['q']['w'], attn['q']['b'], ln=(n1w, n1b))
        # standalone LN only feeds the spatial-reduction conv
        xn = pallas_layernorm(x, n1w, n1b)
        tokens, _, _ = conv_nonoverlap_tokens(xn, H, W, attn['sr']['w'], attn['sr']['b'])
        kv_flat = pallas_linear(tokens, attn['wkv'], attn['bkv'],
                                ln=(attn['norm']['w'], attn['norm']['b']))
    else:
        qkv = pallas_linear(x, attn['wqkv'], attn['bqkv'], ln=(n1w, n1b))
        dout = attn['dim_out']
        q_flat, kv_flat = qkv[..., :dout], qkv[..., dout:]
    # attention + output projection + residual fused in one kernel
    x = attention_block(attn, q_flat, kv_flat, resid=x, alpha=1.0, conf=None)
    # LN + MLP + residual fused in one kernel
    return pallas_mlp_block(x, p['norm2'], p['mlp'], 1.0)


def my_block_forward(p, x, x_source, loc, H, W, conf_source=None):
    attn = p['attn']
    n1w, n1b = p['norm1']['w'], p['norm1']['b']
    dout = attn['dim_out']
    alpha = p['alpha']
    if attn['sr_ratio'] > 1:
        q_flat = pallas_linear(x, attn['q']['w'], attn['q']['b'], ln=(n1w, n1b))
        xs_n = pallas_layernorm(x_source, n1w, n1b)
        fmap = token2map(xs_n, loc, (H, W), attn['sr_ratio'] - 1, 2)
        tokens, _, _ = conv_nonoverlap_nchw_tokens(fmap, attn['sr']['w'], attn['sr']['b'])
        kv_flat = pallas_linear(tokens, attn['wkv'], attn['bkv'],
                                ln=(attn['norm']['w'], attn['norm']['b']))
    elif x is x_source:
        # self-attention without spatial reduction: norm1 + Q + K + V in ONE fused matmul
        qkv = pallas_linear(x, attn['wqkv'], attn['bqkv'], ln=(n1w, n1b))
        q_flat, kv_flat = qkv[..., :dout], qkv[..., dout:]
    else:
        q_flat = pallas_linear(x, attn['q']['w'], attn['q']['b'], ln=(n1w, n1b))
        kv_flat = pallas_linear(x_source, attn['wkv'], attn['bkv'], ln=(n1w, n1b))
    resid = pallas_linear(x, p['fc']['w'], p['fc']['b']) if p['fc'] is not None else x
    x = attention_block(attn, q_flat, kv_flat, resid=resid, alpha=alpha, conf=conf_source)
    return pallas_mlp_block(x, p['norm2'], p['mlp'], alpha)


def down_layer_forward(p, x, pos, pos_embed, H, W, pos_size, N_grid, rng_key):
    B, N, C = x.shape
    ks = p['block']['attn']['sr_ratio'] - 1
    fmap = token2map(x, pos, (H, W), ks, 2)
    fmap = conv2d_nchw(fmap, p['conv']['w'], p['conv']['b'], stride=1, padding=1)
    x = map2token(fmap, pos)
    x_grid, x_ada = x[:, :N_grid], x[:, N_grid:]
    pos_grid, pos_ada = pos[:, :N_grid], pos[:, N_grid:]
    # fused LayerNorm + conf projection
    conf = pallas_linear(x, p['conf']['w'], p['conf']['b'],
                         ln=(p['norm']['w'], p['norm']['b']))   # (B, N, 1)
    conf_ada = conf[:, N_grid:]
    k = p['sample_num']
    idx = gumble_top_k(conf_ada, k, rng_key)                    # (B, k)
    x_down = jnp.take_along_axis(x_ada, jnp.broadcast_to(idx[:, :, None], (B, k, C)), axis=1)
    pos_down = jnp.take_along_axis(pos_ada, jnp.broadcast_to(idx[:, :, None], (B, k, 2)), axis=1)
    x_down = jnp.concatenate([x_grid, x_down], axis=1)
    pos_down = jnp.concatenate([pos_grid, pos_down], axis=1)
    x_down = my_block_forward(p['block'], x_down, x, pos, H, W, conf)
    pos_feature = get_pos_embed(pos_embed, pos_down, pos_size)
    return x_down + pos_feature, pos_down


def mypvt9_forward(params, x, cfg, rng):
    B = x.shape[0]
    # patch embed: non-overlapping conv (Pallas matmul) -> tokens -> LN
    xt, H, W = conv_nonoverlap_nchw_tokens(x, params['patch_embed']['proj']['w'],
                                           params['patch_embed']['proj']['b'])
    xt = pallas_layernorm(xt, params['patch_embed']['norm']['w'], params['patch_embed']['norm']['b'])
    xt = xt + params['pos_embed1']
    for blk in params['block1']:
        xt = pvt_block_forward(blk, xt, H, W)

    # grid / adaptive token split (static index computation)
    ys = np.arange(H, dtype=np.float32) / (H - 1)
    xs = np.arange(W, dtype=np.float32) / (W - 1)
    y_map, x_map = np.meshgrid(ys, xs, indexing='ij')
    xy_map = np.stack((x_map, y_map), axis=-1).reshape(-1, 2)
    loc = jnp.asarray(np.broadcast_to(xy_map[None], (B, H * W, 2)).copy(), jnp.float32)
    gs = cfg['grid_stride']
    pos_np = np.arange(H * W).reshape(H, W)
    pos_grid_idx = pos_np[gs // 2:H:gs, gs // 2:W:gs].reshape(-1)
    mask = np.ones(H * W, dtype=bool)
    mask[pos_grid_idx] = False
    pos_ada_idx = np.arange(H * W)[mask]
    x_grid, x_ada = xt[:, pos_grid_idx], xt[:, pos_ada_idx]
    loc_grid, loc_ada = loc[:, pos_grid_idx], loc[:, pos_ada_idx]
    xt = jnp.concatenate([x_grid, x_ada], axis=1)
    loc = jnp.concatenate([loc_grid, loc_ada], axis=1)
    N_grid = x_grid.shape[1]

    k1, k2, k3 = jax.random.split(rng, 3)
    pos_size = cfg['pos_size']
    xt, loc = down_layer_forward(params['down1'], xt, loc, params['pos_embed2'], H, W, pos_size, N_grid, k1)
    H, W = H // 2, W // 2
    for blk in params['block2']:
        xt = my_block_forward(blk, xt, xt, loc, H, W)
    xt, loc = down_layer_forward(params['down2'], xt, loc, params['pos_embed3'], H, W, pos_size, N_grid, k2)
    H, W = H // 2, W // 2
    for blk in params['block3']:
        xt = my_block_forward(blk, xt, xt, loc, H, W)
    xt, _pos = down_layer_forward(params['down3'], xt, loc, params['pos_embed4'], H, W, pos_size, N_grid, k3)
    H, W = H // 2, W // 2
    cls = jnp.broadcast_to(params['cls_token'], (B, 1, params['cls_token'].shape[-1]))
    xt = jnp.concatenate([cls, xt], axis=1)
    for blk in params['block4']:
        xt = my_block_forward(blk, xt, xt, loc, H, W)
    # final LayerNorm fused into the classifier (LN is per-token, so LN(x)[:, 0] == LN(x[:, 0]))
    return pallas_linear(xt[:, 0], params['head']['w'], params['head']['b'],
                         ln=(params['norm']['w'], params['norm']['b']))


# ----------------------------- main -----------------------------

if __name__ == "__main__":
    cfg = dict(
        img_size=32, patch_size=4, in_chans=3, num_classes=10,
        embed_dims=[16, 32, 64, 128], num_heads=[1, 2, 4, 8],
        mlp_ratios=[2, 2, 2, 2], depths=[1, 2, 1, 1],
        sr_ratios=[8, 4, 2, 1], alpha=1.0,
    )
    cfg['grid_stride'] = cfg['sr_ratios'][0]
    cfg['pos_size'] = [cfg['img_size'] // cfg['patch_size']] * 2

    kg = KeyGen(0)
    params = init_mypvt9(kg, cfg)

    key = jax.random.PRNGKey(0)
    kx, kn = jax.random.split(key)
    x = jax.random.normal(kx, (2, cfg['in_chans'], cfg['img_size'], cfg['img_size']), jnp.float32)

    @jax.jit
    def run(inp, rng):
        return mypvt9_forward(params, inp, cfg, rng)

    out = jax.block_until_ready(run(x, kn))
    assert out.shape == (2, cfg['num_classes'])
    assert bool(jnp.all(jnp.isfinite(out)))
    print("KERNEL_OK")
</pallas_src>

<mosaic_0001>
module attributes {stable_mosaic.version = 11 : i64} {
  func.func @_ln_linear_kernel(%arg0: i32, %arg1: memref<8x128xf32, #tpu.memory_space<vmem>>, %arg2: memref<1x128xf32, #tpu.memory_space<vmem>>, %arg3: memref<1x128xf32, #tpu.memory_space<vmem>>, %arg4: memref<128x10xbf16, #tpu.memory_space<vmem>>, %arg5: memref<1x10xf32, #tpu.memory_space<vmem>>, %arg6: memref<8x10xf32, #tpu.memory_space<vmem>>) attributes {dimension_semantics = [#tpu.dimension_semantics<parallel>], iteration_bounds = array<i64: 1>, scalar_prefetch = 0 : i64, scratch_operands = 0 : i64, tpu.core_type = #tpu.core_type<tc>, window_params = [{transform_indices = @transform_0, window_bounds = array<i64: 8, 128>}, {pipeline_mode = #tpu.pipeline_mode<synchronous>, transform_indices = @transform_1, window_bounds = array<i64: 1, 128>}, {pipeline_mode = #tpu.pipeline_mode<synchronous>, transform_indices = @transform_2, window_bounds = array<i64: 1, 128>}, {pipeline_mode = #tpu.pipeline_mode<synchronous>, transform_indices = @transform_3, window_bounds = array<i64: 128, 10>}, {pipeline_mode = #tpu.pipeline_mode<synchronous>, transform_indices = @transform_4, window_bounds = array<i64: 1, 10>}, {transform_indices = @transform_5, window_bounds = array<i64: 8, 10>}]} {
    %c0 = arith.constant 0 : index
    %c0_0 = arith.constant 0 : index
    %0 = vector.load %arg1[%c0, %c0_0] : memref<8x128xf32, #tpu.memory_space<vmem>>, vector<8x128xf32>
    %c0_1 = arith.constant 0 : index
    %c0_2 = arith.constant 0 : index
    %1 = vector.load %arg2[%c0_1, %c0_2] : memref<1x128xf32, #tpu.memory_space<vmem>>, vector<1x128xf32>
    %c0_3 = arith.constant 0 : index
    %c0_4 = arith.constant 0 : index
    %2 = vector.load %arg3[%c0_3, %c0_4] : memref<1x128xf32, #tpu.memory_space<vmem>>, vector<1x128xf32>
    %cst = arith.constant dense<0.000000e+00> : vector<8xf32>
    %3 = vector.multi_reduction <add>, %0, %cst [1] : vector<8x128xf32> to vector<8xf32>
    %4 = vector.shape_cast %3 : vector<8xf32> to vector<8x1xf32>
    %cst_5 = arith.constant 1.280000e+02 : f32
    %5 = vector.broadcast %cst_5 : f32 to vector<8x1xf32>
    %6 = arith.divf %4, %5 : vector<8x1xf32>
    %7 = vector.broadcast %6 : vector<8x1xf32> to vector<8x128xf32>
    %8 = arith.subf %0, %7 : vector<8x128xf32>
    %9 = arith.mulf %8, %8 : vector<8x128xf32>
    %cst_6 = arith.constant dense<0.000000e+00> : vector<8xf32>
    %10 = vector.multi_reduction <add>, %9, %cst_6 [1] : vector<8x128xf32> to vector<8xf32>
    %11 = vector.shape_cast %10 : vector<8xf32> to vector<8x1xf32>
    %cst_7 = arith.constant 1.280000e+02 : f32
    %12 = vector.broadcast %cst_7 : f32 to vector<8x1xf32>
    %13 = arith.divf %11, %12 : vector<8x1xf32>
    %cst_8 = arith.constant 9.99999974E-6 : f32
    %14 = vector.broadcast %cst_8 : f32 to vector<8x1xf32>
    %15 = arith.addf %13, %14 : vector<8x1xf32>
    %16 = math.rsqrt %15 : vector<8x1xf32>
    %17 = vector.broadcast %16 : vector<8x1xf32> to vector<8x128xf32>
    %18 = arith.mulf %8, %17 : vector<8x128xf32>
    %19 = vector.broadcast %1 : vector<1x128xf32> to vector<8x128xf32>
    %20 = arith.mulf %18, %19 : vector<8x128xf32>
    %21 = vector.broadcast %2 : vector<1x128xf32> to vector<8x128xf32>
    %22 = arith.addf %20, %21 : vector<8x128xf32>
    %23 = arith.truncf %22 : vector<8x128xf32> to vector<8x128xbf16>
    %c0_9 = arith.constant 0 : index
    %c0_10 = arith.constant 0 : index
    %24 = vector.load %arg4[%c0_9, %c0_10] : memref<128x10xbf16, #tpu.memory_space<vmem>>, vector<128x10xbf16>
    %cst_11 = arith.constant dense<0.000000e+00> : vector<8x10xf32>
    %25 = tpu.matmul %23, %24, %cst_11 {dimension_numbers = #tpu.dot_dimension_numbers<[1], [0], [0], [1], [0, 0, 1, 1], [], []>} : vector<8x128xbf16>, vector<128x10xbf16>, vector<8x10xf32> -> vector<8x10xf32>
    %c0_12 = arith.constant 0 : index
    %c0_13 = arith.constant 0 : index
    %26 = vector.load %arg5[%c0_12, %c0_13] : memref<1x10xf32, #tpu.memory_space<vmem>>, vector<1x10xf32>
    %27 = vector.broadcast %26 : vector<1x10xf32> to vector<8x10xf32>
    %28 = arith.addf %25, %27 : vector<8x10xf32>
    %c0_14 = arith.constant 0 : index
    %c0_15 = arith.constant 0 : index
    %29 = vector.load %arg6[%c0_14, %c0_15] : memref<8x10xf32, #tpu.memory_space<vmem>>, vector<8x10xf32>
    tpu.vector_store %arg6[%c0_14, %c0_15], %28 {strides = array<i32>} : memref<8x10xf32, #tpu.memory_space<vmem>>, vector<8x10xf32>,
    return
  }
  func.func @transform_0(%arg0: i32) -> (i32, i32) {
    %c0_i32 = arith.constant 0 : i32
    %c0_i32_0 = arith.constant 0 : i32
    return %arg0, %c0_i32 : i32, i32
  }
  func.func @transform_1(%arg0: i32) -> (i32, i32) {
    %c0_i32 = arith.constant 0 : i32
    %c0_i32_0 = arith.constant 0 : i32
    %c0_i32_1 = arith.constant 0 : i32
    return %c0_i32, %c0_i32_0 : i32, i32
  }
  func.func @transform_2(%arg0: i32) -> (i32, i32) {
    %c0_i32 = arith.constant 0 : i32
    %c0_i32_0 = arith.constant 0 : i32
    %c0_i32_1 = arith.constant 0 : i32
    return %c0_i32, %c0_i32_0 : i32, i32
  }
  func.func @transform_3(%arg0: i32) -> (i32, i32) {
    %c0_i32 = arith.constant 0 : i32
    %c0_i32_0 = arith.constant 0 : i32
    %c0_i32_1 = arith.constant 0 : i32
    return %c0_i32, %c0_i32_0 : i32, i32
  }
  func.func @transform_4(%arg0: i32) -> (i32, i32) {
    %c0_i32 = arith.constant 0 : i32
    %c0_i32_0 = arith.constant 0 : i32
    %c0_i32_1 = arith.constant 0 : i32
    return %c0_i32, %c0_i32_0 : i32, i32
  }
  func.func @transform_5(%arg0: i32) -> (i32, i32) {
    %c0_i32 = arith.constant 0 : i32
    %c0_i32_0 = arith.constant 0 : i32
    return %arg0, %c0_i32 : i32, i32
  }
}

</mosaic_0001>

<bundles_post_ra>
// kernel: run.1
= control target key start
LH: loop header
LB: loop body
LE: loop exit
PB: predicated region body
PF: predicated region fallthrough
CT: control target
= control target key end

     0   :  { %10 = vsyncpa [#allocation3], 0  ;;  %s240_s21 = smov [#allocation2]   ;;  %s241_s23 = smov 64   ;;  %s292_s0 = inlined_call_operand.vmem [shape: f32[8,128], index: 0, kind: input, shape index: {}]   ;;  %s293_s1 = inlined_call_operand.vmem [shape: f32[1,128], index: 1, kind: input, shape index: {}]   ;;  %s294_s2 = inlined_call_operand.vmem [shape: f32[1,128], index: 2, kind: input, shape index: {}]   ;;  %s295_s3 = inlined_call_operand.hbm [shape: bf16[128,10], index: 3, kind: input, shape index: {}]   ;;  %s296_s4 = inlined_call_operand.vmem [shape: f32[1,10], index: 4, kind: input, shape index: {}]   ;;  %s297_s5 = inlined_call_operand.vmem [shape: f32[8,10], index: 5, kind: output, shape index: {}]  }
   0x1   :  { %s21_s20 = sshll.u32 %s295_s3, 4  ;;  %s23_s22 = sshll.u32 %s240_s21, 4  ;;  %s22_s20 = int_to_ptr.hbm [resolvable:$true] %s21_s20  ;;  %s24_s22 = int_to_ptr.vmem [resolvable:$true] %s23_s22 }
   0x2   :  { %s242_s24 = smov 4  }
   0x3   :  { %29 = dma.hbm_to_vmem [thread:$0]  %s22_s20, 1024, %s24_s22, [#allocation3], %s241_s23, %s241_s23, %s242_s24  }
   0x4   :  { %238 = dma.done.wait [#allocation3], 1024  }
   0x5   :  { %239 = vsyncadd [#allocation3], 4294966272  ;;  %v36_v0 = vld [vmem:[%s292_s0] sm:$0xff]  ;;  %v243_v1 = vmov 128.0   ;;  %v202_v2 = vld [vmem:[#allocation2 + $0x38] sm:$0xff]  ;;  %vm156_vm4 = vcmask 80896  }
   0x6   :  { %39 = vadd.xlane.f32.xlu0 %v36_v0  ;;  %210 = vrcp.f32 %v243_v1  ;;  %143 = vmatpush.bf16.msra.mxu0 %v202_v2  ;;  %v201_v13 = vld [vmem:[#allocation2 + $0x30] sm:$0xff]  ;;  %v200_v14 = vld [vmem:[#allocation2 + $0x28] sm:$0xff]  ;;  %v199_v15 = vld [vmem:[#allocation2 + $0x20] sm:$0xff] }
   0x7   :  { %v198_v16 = vld [vmem:[#allocation2 + $0x18] sm:$0xff]  ;;  %v197_v17 = vld [vmem:[#allocation2 + $0x10] sm:$0xff]  ;;  %v196_v18 = vld [vmem:[#allocation2 + $0x8] sm:$0xff] }
   0x8   :  { %v195_v19 = vld [vmem:[#allocation2] sm:$0xff] }
   0x9   :  { %v207_v29 = vld [vmem:[%s293_s1] ss:$0 sm:$0xff] }
   0xa   :  { %144 = vmatpush.bf16.msra.mxu0 %v201_v13  ;;  %v208_v32 = vld [vmem:[%s294_s2] ss:$0 sm:$0xff] }
   0xb   :  { %v209_v36 = vld [vmem:[%s296_s4] ss:$0 sm:$0xff] }
   0xc   :  { %v211_v3 = vpop.eup %210 }
   0xd   :  { %v42_v4 = vmul.f32 128.0, %v211_v3  ;;  %vm46_vm0 = vweird.f32 %v211_v3 }
   0xe   :  { %145 = vmatpush.bf16.msra.mxu0 %v200_v14 }
   0xf   :  { %v43_v5 = vsub.f32 1.0, %v42_v4 }
  0x11   :  { %v44_v6 = vmul.f32 %v211_v3, %v43_v5 }
  0x12   :  { %146 = vmatpush.bf16.msra.mxu0 %v199_v15 }
  0x13   :  { %v45_v7 = vadd.f32 %v211_v3, %v44_v6 }
  0x15   :  { %v47_v8 = vsel %vm46_vm0, %v211_v3, %v45_v7 }
  0x16   :  { %147 = vmatpush.bf16.msra.mxu0 %v198_v16 }
  0x1a   :  { %148 = vmatpush.bf16.msra.mxu0 %v197_v17 }
  0x1e   :  { %149 = vmatpush.bf16.msra.mxu0 %v196_v18 }
  0x22   :  { %150 = vmatpush.bf16.msra.mxu0 %v195_v19 }
  0x79   :  { %v40_v9 = vpop.xlane.xlu0 %39 }
  0x7a   :  { %v48_v10 = vmul.f32 %v47_v8, %v40_v9 }
  0x7c   :  { %v49_v11 = vsub.f32 %v36_v0, %v48_v10 }
  0x7e   :  { %v50_v12 = vmul.f32 %v49_v11, %v49_v11 }
  0x80   :  { %51 = vadd.xlane.f32.xlu0 %v50_v12 }
  0xf3   :  { %v52_v20 = vpop.xlane.xlu0 %51 }
  0xf4   :  { %v53_v21 = vmul.f32 %v52_v20, %v47_v8 }
  0xf6   :  { %v54_v22 = vadd.f32 1e-05, %v53_v21 }
  0xf8   :  { %212 = vrsqrt.f32 %v54_v22  ;;  %vm61_vm2 = vweird.f32 %v54_v22 }
  0xfe   :  { %v213_v23 = vpop.eup %212 }
  0xff   :  { %v56_v24 = vmul.f32 %v213_v23, %v54_v22  ;;  %vm62_vm1 = vweird.f32 %v213_v23 }
 0x100   :  { %vm63_vm3 = vmor %vm61_vm2, %vm62_vm1 }
 0x101   :  { %v57_v25 = vmul.f32 %v213_v23, %v56_v24 }
 0x103   :  { %v58_v26 = vmul.f32 0.5, %v57_v25 }
 0x105   :  { %v59_v27 = vsub.f32 1.5, %v58_v26 }
 0x107   :  { %v60_v28 = vmul.f32 %v213_v23, %v59_v27 }
 0x109   :  { %v64_v30 = vsel %vm63_vm3, %v213_v23, %v60_v28 }
 0x10a   :  { %v65_v31 = vmul.f32 %v64_v30, %v49_v11 }
 0x10c   :  { %v69_v33 = vmul.f32 %v207_v29, %v65_v31 }
 0x10e   :  { %v73_v34 = vadd.f32 %v208_v32, %v69_v33 }
 0x110   :  { %v74_v35 = vpack.c.bf16 %v73_v34, %v73_v34 }
 0x112   :  { %151 = vmatmul.bf16.vlgmr.msra.gmra.mxu0 %v74_v35 }
 0x18f   :  { %v152_v37 = vpop.f32.mrf.mxu0 }
 0x190   :  { %v153_v38 = vadd.f32 %v209_v36, %v152_v37 }
 0x192   :  { %157 = vst.msk [vmem:[%s297_s5] sm:$0xff] %vm156_vm4, %v153_v38 }
 0x197   :  { %v154_v39 = vpop.f32.mrf.mxu0 }
 0x198   :  { %162 = vsyncpa [#allocation3], 1 }

</bundles_post_ra>
